<compile_context>
chip_gen: v7x
topology: tpu7x:2x2x1
jax: 0.10.0
libtpu: 0.0.40
codegen_flags: <defaults>
</compile_context>

<pallas_src>
import functools

import jax
import jax.numpy as jnp
from jax.experimental import pallas as pl
from jax.experimental.pallas import tpu as pltpu


# ---------------------------------------------------------------------------
# Fused forward kernel
# ---------------------------------------------------------------------------
def fused_gat_forward_kernel(x_ref, adj_ref, pool_ref, *refs,
                             num_conv, num_fc, heads, hidden):
    """Full GATClassifier forward.

    refs layout (inputs): [w_l, a_cat_l, b_l] * num_conv,
                          [fc_w_i, fc_b_i]   * num_fc,
                          out_w_pad, out_b_pad
    refs[-1] is the output ref ([B, 128] lane-dense logits slab).
    """
    o_ref = refs[-1]
    out_w_ref = refs[-3]
    out_b_ref = refs[-2]

    neg_slope = 0.2
    # Edge mask hoisted once for all layers / heads.
    mask = adj_ref[...] > 0                                      # [N, N] bool

    h = x_ref[...].astype(jnp.float32)                           # [N, F_in]
    for l in range(num_conv):
        w = refs[3 * l][...]                                     # bf16 [F_in, H*C]
        a_cat = refs[3 * l + 1][...]                             # bf16 [H*C, 2H]
        b = refs[3 * l + 2][...].astype(jnp.float32)             # [1, H*C]

        hw = jnp.dot(h.astype(jnp.bfloat16), w,
                     preferred_element_type=jnp.float32)         # [N, H*C]
        # All heads' attention coefficients in one MXU pass:
        # cols [0:heads] = a_src . h,  cols [heads:2*heads] = a_dst . h
        alpha = jnp.dot(hw.astype(jnp.bfloat16), a_cat,
                        preferred_element_type=jnp.float32)      # [N, 2H]

        parts = []
        for k in range(heads):
            hk = hw[:, k * hidden:(k + 1) * hidden]              # [N, C]
            a_src = alpha[:, k:k + 1]                            # [N, 1]
            a_dst = alpha[:, heads + k:heads + k + 1]            # [N, 1]
            # e[dst, src] = leaky_relu(a_dst[dst] + a_src[src])
            e = a_dst + jnp.transpose(a_src)                     # [N, N]
            e = jnp.where(e > 0, e, neg_slope * e)
            e = jnp.where(mask, e, -1e30)
            e = e - jnp.max(e, axis=-1, keepdims=True)           # self-loops keep max finite
            p = jnp.exp(e)                                       # masked entries underflow to 0
            denom = jnp.sum(p, axis=-1, keepdims=True)
            attn = p * pl.reciprocal(denom, approx=True)         # EUP vrcp
            parts.append(jnp.dot(attn.astype(jnp.bfloat16), hk.astype(jnp.bfloat16),
                                 preferred_element_type=jnp.float32))
        # Lane-dense reassembly in registers; fused bias + ReLU. No partial stores.
        h = jnp.maximum(jnp.concatenate(parts, axis=-1) + b, 0.0)

    # global_mean_pool as matmul: [B, N] @ [N, H*C] -> [B, H*C]
    g = jnp.dot(pool_ref[...], h.astype(jnp.bfloat16),
                preferred_element_type=jnp.float32)

    base = 3 * num_conv
    for i in range(num_fc):
        w = refs[base + 2 * i][...]                              # bf16
        bb = refs[base + 2 * i + 1][...].astype(jnp.float32)
        # F.dropout in eval mode is the identity (inference semantics).
        g = jnp.maximum(jnp.dot(g.astype(jnp.bfloat16), w,
                                preferred_element_type=jnp.float32) + bb, 0.0)

    # Output head padded to 128 lanes wrapper-side -> single full-width store.
    o_ref[...] = (jnp.dot(g.astype(jnp.bfloat16), out_w_ref[...],
                          preferred_element_type=jnp.float32)
                  + out_b_ref[...].astype(jnp.float32))


# ---------------------------------------------------------------------------
# Wrapper (one pallas_call, whole-array VMEM blocks; graphs are small)
# ---------------------------------------------------------------------------
def gat_classifier_forward(x, adj, pool, params, *, heads, hidden):
    num_conv = len(params["convs"])
    num_fc = len(params["fcs"])
    flat = []
    for (w, a_cat, b) in params["convs"]:
        flat.extend([w, a_cat, b])
    for (w, b) in params["fcs"]:
        flat.extend([w, b])
    flat.extend([params["out_w_pad"], params["out_b_pad"]])

    n_in = 3 + len(flat)
    b_graphs = pool.shape[0]
    out_pad = params["out_w_pad"].shape[1]                       # 128 lanes

    logits_pad = pl.pallas_call(
        functools.partial(fused_gat_forward_kernel, num_conv=num_conv,
                          num_fc=num_fc, heads=heads, hidden=hidden),
        out_shape=jax.ShapeDtypeStruct((b_graphs, out_pad), jnp.float32),
        in_specs=[pl.BlockSpec(memory_space=pltpu.MemorySpace.VMEM)] * n_in,
        out_specs=pl.BlockSpec(memory_space=pltpu.MemorySpace.VMEM),
        compiler_params=pltpu.CompilerParams(vmem_limit_bytes=32 * 1024 * 1024),
    )(x, adj, pool, *flat)
    return logits_pad[:, :2]


# ---------------------------------------------------------------------------
# Deterministic parameter / graph construction (synthetic, no file I/O)
# ---------------------------------------------------------------------------
def glorot(key, shape):
    limit = (6.0 / (shape[0] + shape[1])) ** 0.5
    return jax.random.uniform(key, shape, jnp.float32, -limit, limit)


def build_a_cat(a_src, a_dst, heads, hidden):
    """Block-diagonal attention-vector matrix [heads*hidden, 2*heads]."""
    out = jnp.zeros((heads * hidden, 2 * heads), jnp.float32)
    for k in range(heads):
        out = out.at[k * hidden:(k + 1) * hidden, k].set(a_src[k])
        out = out.at[k * hidden:(k + 1) * hidden, heads + k].set(a_dst[k])
    return out.astype(jnp.bfloat16)


def init_params(key, num_node_features, num_conv_layers, hidden_channels,
                n_heads, num_mlp_layers, mlp_neurons, out_pad=128):
    params = {"convs": [], "fcs": []}
    for i in range(num_conv_layers):
        in_dim = num_node_features if i == 0 else hidden_channels * n_heads
        key, k1, k2, k3 = jax.random.split(key, 4)
        w = glorot(k1, (in_dim, n_heads * hidden_channels)).astype(jnp.bfloat16)
        a_src = glorot(k2, (n_heads, hidden_channels))
        a_dst = glorot(k3, (n_heads, hidden_channels))
        a_cat = build_a_cat(a_src, a_dst, n_heads, hidden_channels)
        b = jnp.zeros((1, n_heads * hidden_channels), jnp.float32)
        params["convs"].append((w, a_cat, b))
    for i in range(num_mlp_layers):
        in_dim = hidden_channels * n_heads if i == 0 else mlp_neurons
        key, k1 = jax.random.split(key)
        params["fcs"].append((glorot(k1, (in_dim, mlp_neurons)).astype(jnp.bfloat16),
                              jnp.zeros((1, mlp_neurons), jnp.float32)))
    key, k1 = jax.random.split(key)
    out_w = glorot(k1, (mlp_neurons, 2))
    # Pad the 2-way head to a lane-dense 128-wide slab (sliced back outside).
    params["out_w_pad"] = jnp.zeros((mlp_neurons, out_pad), jnp.float32) \
        .at[:, :2].set(out_w).astype(jnp.bfloat16)
    params["out_b_pad"] = jnp.zeros((1, out_pad), jnp.float32)
    return params


def edge_index_to_adj(edge_index, num_nodes):
    src, dst = edge_index[0], edge_index[1]
    adj = jnp.zeros((num_nodes, num_nodes), jnp.float32)
    adj = adj.at[dst, src].set(1.0)
    # GATConv default add_self_loops=True
    adj = jnp.maximum(adj, jnp.eye(num_nodes, dtype=jnp.float32))
    return adj.astype(jnp.bfloat16)          # only O(N^2) operand -> halve traffic


def batch_to_pool(batch, num_graphs):
    onehot = (batch[None, :] == jnp.arange(num_graphs)[:, None]).astype(jnp.float32)
    counts = jnp.sum(onehot, axis=1, keepdims=True)
    return (onehot / jnp.maximum(counts, 1.0)).astype(jnp.bfloat16)


if __name__ == "__main__":
    # Hyperparameters (synthetic stand-ins for the bayesian-optimisation config).
    num_node_features = 8      # len(atom_properties_dict['C']) + 1 in the original
    num_conv_layers = 2
    hidden_channels = 8
    n_heads = 2
    num_mlp_layers = 2
    mlp_neurons = 16

    # Small synthetic batch of 2 molecular graphs, 8 atoms each (chain bonds).
    num_graphs = 2
    nodes_per_graph = 8
    num_nodes = num_graphs * nodes_per_graph

    key = jax.random.PRNGKey(0)
    key, kx = jax.random.split(key)
    x = jax.random.normal(kx, (num_nodes, num_node_features), jnp.float32)

    edges = []
    for g in range(num_graphs):
        base = g * nodes_per_graph
        for i in range(nodes_per_graph - 1):
            edges.append((base + i, base + i + 1))
            edges.append((base + i + 1, base + i))
    edge_index = jnp.array(edges, dtype=jnp.int32).T            # [2, E]
    batch = jnp.repeat(jnp.arange(num_graphs, dtype=jnp.int32), nodes_per_graph)

    adj = edge_index_to_adj(edge_index, num_nodes)               # [N, N] bf16
    pool = batch_to_pool(batch, num_graphs)                      # [B, N] bf16

    params = init_params(jax.random.PRNGKey(1), num_node_features,
                         num_conv_layers, hidden_channels, n_heads,
                         num_mlp_layers, mlp_neurons)

    logits = gat_classifier_forward(x, adj, pool, params,
                                    heads=n_heads, hidden=hidden_channels)
    logits = jax.block_until_ready(logits)
    assert logits.shape == (num_graphs, 2)
    assert bool(jnp.all(jnp.isfinite(logits)))
    print("KERNEL_OK")
</pallas_src>

<mosaic_0001>
module attributes {stable_mosaic.version = 11 : i64} {
  func.func @fused_gat_forward_kernel(%arg0: memref<16x8xf32, #tpu.memory_space<vmem>>, %arg1: memref<16x16xbf16, #tpu.memory_space<vmem>>, %arg2: memref<2x16xbf16, #tpu.memory_space<vmem>>, %arg3: memref<8x16xbf16, #tpu.memory_space<vmem>>, %arg4: memref<16x4xbf16, #tpu.memory_space<vmem>>, %arg5: memref<1x16xf32, #tpu.memory_space<vmem>>, %arg6: memref<16x16xbf16, #tpu.memory_space<vmem>>, %arg7: memref<16x4xbf16, #tpu.memory_space<vmem>>, %arg8: memref<1x16xf32, #tpu.memory_space<vmem>>, %arg9: memref<16x16xbf16, #tpu.memory_space<vmem>>, %arg10: memref<1x16xf32, #tpu.memory_space<vmem>>, %arg11: memref<16x16xbf16, #tpu.memory_space<vmem>>, %arg12: memref<1x16xf32, #tpu.memory_space<vmem>>, %arg13: memref<16x128xbf16, #tpu.memory_space<vmem>>, %arg14: memref<1x128xf32, #tpu.memory_space<vmem>>, %arg15: memref<2x128xf32, #tpu.memory_space<vmem>>) attributes {dimension_semantics = [], scalar_prefetch = 0 : i64, scratch_operands = 0 : i64, tpu.core_type = #tpu.core_type<tc>} {
    %c0 = arith.constant 0 : index
    %c0_0 = arith.constant 0 : index
    %0 = vector.load %arg1[%c0, %c0_0] : memref<16x16xbf16, #tpu.memory_space<vmem>>, vector<16x16xbf16>
    %cst = arith.constant 0.000000e+00 : bf16
    %1 = vector.broadcast %cst : bf16 to vector<16x16xbf16>
    %2 = arith.cmpf ogt, %0, %1 : vector<16x16xbf16>
    %c0_1 = arith.constant 0 : index
    %c0_2 = arith.constant 0 : index
    %3 = vector.load %arg0[%c0_1, %c0_2] : memref<16x8xf32, #tpu.memory_space<vmem>>, vector<16x8xf32>
    %c0_3 = arith.constant 0 : index
    %c0_4 = arith.constant 0 : index
    %4 = vector.load %arg3[%c0_3, %c0_4] : memref<8x16xbf16, #tpu.memory_space<vmem>>, vector<8x16xbf16>
    %c0_5 = arith.constant 0 : index
    %c0_6 = arith.constant 0 : index
    %5 = vector.load %arg4[%c0_5, %c0_6] : memref<16x4xbf16, #tpu.memory_space<vmem>>, vector<16x4xbf16>
    %c0_7 = arith.constant 0 : index
    %c0_8 = arith.constant 0 : index
    %6 = vector.load %arg5[%c0_7, %c0_8] : memref<1x16xf32, #tpu.memory_space<vmem>>, vector<1x16xf32>
    %7 = arith.truncf %3 : vector<16x8xf32> to vector<16x8xbf16>
    %cst_9 = arith.constant dense<0.000000e+00> : vector<16x16xf32>
    %8 = tpu.matmul %7, %4, %cst_9 {dimension_numbers = #tpu.dot_dimension_numbers<[1], [0], [0], [1], [0, 0, 1, 1], [], []>} : vector<16x8xbf16>, vector<8x16xbf16>, vector<16x16xf32> -> vector<16x16xf32>
    %9 = arith.truncf %8 : vector<16x16xf32> to vector<16x16xbf16>
    %cst_10 = arith.constant dense<0.000000e+00> : vector<16x4xf32>
    %10 = tpu.matmul %9, %5, %cst_10 {dimension_numbers = #tpu.dot_dimension_numbers<[1], [0], [0], [1], [0, 0, 1, 1], [], []>} : vector<16x16xbf16>, vector<16x4xbf16>, vector<16x4xf32> -> vector<16x4xf32>
    %11 = vector.extract_strided_slice %8 {offsets = [0, 0], sizes = [16, 8], strides = [1, 1]} : vector<16x16xf32> to vector<16x8xf32>
    %12 = vector.extract_strided_slice %10 {offsets = [0, 0], sizes = [16, 1], strides = [1, 1]} : vector<16x4xf32> to vector<16x1xf32>
    %13 = vector.extract_strided_slice %10 {offsets = [0, 2], sizes = [16, 1], strides = [1, 1]} : vector<16x4xf32> to vector<16x1xf32>
    %14 = tpu.transpose %12, [1, 0] : vector<16x1xf32> -> vector<1x16xf32>
    %15 = vector.broadcast %13 : vector<16x1xf32> to vector<16x16xf32>
    %16 = vector.broadcast %14 : vector<1x16xf32> to vector<16x16xf32>
    %17 = arith.addf %15, %16 : vector<16x16xf32>
    %cst_11 = arith.constant 0.000000e+00 : f32
    %18 = vector.broadcast %cst_11 : f32 to vector<16x16xf32>
    %19 = arith.cmpf ogt, %17, %18 : vector<16x16xf32>
    %cst_12 = arith.constant 2.000000e-01 : f32
    %20 = vector.broadcast %cst_12 : f32 to vector<16x16xf32>
    %21 = arith.mulf %20, %17 : vector<16x16xf32>
    %22 = arith.select %19, %17, %21 : vector<16x16xi1>, vector<16x16xf32>
    %cst_13 = arith.constant -1.000000e+30 : f32
    %23 = vector.broadcast %cst_13 : f32 to vector<16x16xf32>
    %24 = arith.select %2, %22, %23 : vector<16x16xi1>, vector<16x16xf32>
    %cst_14 = arith.constant dense<0xFF800000> : vector<16xf32>
    %25 = vector.multi_reduction <maximumf>, %24, %cst_14 [1] : vector<16x16xf32> to vector<16xf32>
    %26 = vector.shape_cast %25 : vector<16xf32> to vector<16x1xf32>
    %27 = vector.broadcast %26 : vector<16x1xf32> to vector<16x16xf32>
    %28 = arith.subf %24, %27 : vector<16x16xf32>
    %29 = math.exp %28 : vector<16x16xf32>
    %cst_15 = arith.constant dense<0.000000e+00> : vector<16xf32>
    %30 = vector.multi_reduction <add>, %29, %cst_15 [1] : vector<16x16xf32> to vector<16xf32>
    %31 = vector.shape_cast %30 : vector<16xf32> to vector<16x1xf32>
    %32 = tpu.reciprocal %31 {approx = true} : vector<16x1xf32> -> vector<16x1xf32>
    %33 = vector.broadcast %32 : vector<16x1xf32> to vector<16x16xf32>
    %34 = arith.mulf %29, %33 : vector<16x16xf32>
    %35 = arith.truncf %34 : vector<16x16xf32> to vector<16x16xbf16>
    %36 = arith.truncf %11 : vector<16x8xf32> to vector<16x8xbf16>
    %cst_16 = arith.constant dense<0.000000e+00> : vector<16x8xf32>
    %37 = tpu.matmul %35, %36, %cst_16 {dimension_numbers = #tpu.dot_dimension_numbers<[1], [0], [0], [1], [0, 0, 1, 1], [], []>} : vector<16x16xbf16>, vector<16x8xbf16>, vector<16x8xf32> -> vector<16x8xf32>
    %38 = vector.extract_strided_slice %8 {offsets = [0, 8], sizes = [16, 8], strides = [1, 1]} : vector<16x16xf32> to vector<16x8xf32>
    %39 = vector.extract_strided_slice %10 {offsets = [0, 1], sizes = [16, 1], strides = [1, 1]} : vector<16x4xf32> to vector<16x1xf32>
    %40 = vector.extract_strided_slice %10 {offsets = [0, 3], sizes = [16, 1], strides = [1, 1]} : vector<16x4xf32> to vector<16x1xf32>
    %41 = tpu.transpose %39, [1, 0] : vector<16x1xf32> -> vector<1x16xf32>
    %42 = vector.broadcast %40 : vector<16x1xf32> to vector<16x16xf32>
    %43 = vector.broadcast %41 : vector<1x16xf32> to vector<16x16xf32>
    %44 = arith.addf %42, %43 : vector<16x16xf32>
    %cst_17 = arith.constant 0.000000e+00 : f32
    %45 = vector.broadcast %cst_17 : f32 to vector<16x16xf32>
    %46 = arith.cmpf ogt, %44, %45 : vector<16x16xf32>
    %cst_18 = arith.constant 2.000000e-01 : f32
    %47 = vector.broadcast %cst_18 : f32 to vector<16x16xf32>
    %48 = arith.mulf %47, %44 : vector<16x16xf32>
    %49 = arith.select %46, %44, %48 : vector<16x16xi1>, vector<16x16xf32>
    %cst_19 = arith.constant -1.000000e+30 : f32
    %50 = vector.broadcast %cst_19 : f32 to vector<16x16xf32>
    %51 = arith.select %2, %49, %50 : vector<16x16xi1>, vector<16x16xf32>
    %cst_20 = arith.constant dense<0xFF800000> : vector<16xf32>
    %52 = vector.multi_reduction <maximumf>, %51, %cst_20 [1] : vector<16x16xf32> to vector<16xf32>
    %53 = vector.shape_cast %52 : vector<16xf32> to vector<16x1xf32>
    %54 = vector.broadcast %53 : vector<16x1xf32> to vector<16x16xf32>
    %55 = arith.subf %51, %54 : vector<16x16xf32>
    %56 = math.exp %55 : vector<16x16xf32>
    %cst_21 = arith.constant dense<0.000000e+00> : vector<16xf32>
    %57 = vector.multi_reduction <add>, %56, %cst_21 [1] : vector<16x16xf32> to vector<16xf32>
    %58 = vector.shape_cast %57 : vector<16xf32> to vector<16x1xf32>
    %59 = tpu.reciprocal %58 {approx = true} : vector<16x1xf32> -> vector<16x1xf32>
    %60 = vector.broadcast %59 : vector<16x1xf32> to vector<16x16xf32>
    %61 = arith.mulf %56, %60 : vector<16x16xf32>
    %62 = arith.truncf %61 : vector<16x16xf32> to vector<16x16xbf16>
    %63 = arith.truncf %38 : vector<16x8xf32> to vector<16x8xbf16>
    %cst_22 = arith.constant dense<0.000000e+00> : vector<16x8xf32>
    %64 = tpu.matmul %62, %63, %cst_22 {dimension_numbers = #tpu.dot_dimension_numbers<[1], [0], [0], [1], [0, 0, 1, 1], [], []>} : vector<16x16xbf16>, vector<16x8xbf16>, vector<16x8xf32> -> vector<16x8xf32>
    %65 = tpu.concatenate %37, %64 in 1 : vector<16x8xf32>, vector<16x8xf32> -> vector<16x16xf32>
    %66 = vector.broadcast %6 : vector<1x16xf32> to vector<16x16xf32>
    %67 = arith.addf %65, %66 : vector<16x16xf32>
    %cst_23 = arith.constant 0.000000e+00 : f32
    %68 = vector.broadcast %cst_23 : f32 to vector<16x16xf32>
    %69 = arith.maximumf %67, %68 : vector<16x16xf32>
    %c0_24 = arith.constant 0 : index
    %c0_25 = arith.constant 0 : index
    %70 = vector.load %arg6[%c0_24, %c0_25] : memref<16x16xbf16, #tpu.memory_space<vmem>>, vector<16x16xbf16>
    %c0_26 = arith.constant 0 : index
    %c0_27 = arith.constant 0 : index
    %71 = vector.load %arg7[%c0_26, %c0_27] : memref<16x4xbf16, #tpu.memory_space<vmem>>, vector<16x4xbf16>
    %c0_28 = arith.constant 0 : index
    %c0_29 = arith.constant 0 : index
    %72 = vector.load %arg8[%c0_28, %c0_29] : memref<1x16xf32, #tpu.memory_space<vmem>>, vector<1x16xf32>
    %73 = arith.truncf %69 : vector<16x16xf32> to vector<16x16xbf16>
    %cst_30 = arith.constant dense<0.000000e+00> : vector<16x16xf32>
    %74 = tpu.matmul %73, %70, %cst_30 {dimension_numbers = #tpu.dot_dimension_numbers<[1], [0], [0], [1], [0, 0, 1, 1], [], []>} : vector<16x16xbf16>, vector<16x16xbf16>, vector<16x16xf32> -> vector<16x16xf32>
    %75 = arith.truncf %74 : vector<16x16xf32> to vector<16x16xbf16>
    %cst_31 = arith.constant dense<0.000000e+00> : vector<16x4xf32>
    %76 = tpu.matmul %75, %71, %cst_31 {dimension_numbers = #tpu.dot_dimension_numbers<[1], [0], [0], [1], [0, 0, 1, 1], [], []>} : vector<16x16xbf16>, vector<16x4xbf16>, vector<16x4xf32> -> vector<16x4xf32>
    %77 = vector.extract_strided_slice %74 {offsets = [0, 0], sizes = [16, 8], strides = [1, 1]} : vector<16x16xf32> to vector<16x8xf32>
    %78 = vector.extract_strided_slice %76 {offsets = [0, 0], sizes = [16, 1], strides = [1, 1]} : vector<16x4xf32> to vector<16x1xf32>
    %79 = vector.extract_strided_slice %76 {offsets = [0, 2], sizes = [16, 1], strides = [1, 1]} : vector<16x4xf32> to vector<16x1xf32>
    %80 = tpu.transpose %78, [1, 0] : vector<16x1xf32> -> vector<1x16xf32>
    %81 = vector.broadcast %79 : vector<16x1xf32> to vector<16x16xf32>
    %82 = vector.broadcast %80 : vector<1x16xf32> to vector<16x16xf32>
    %83 = arith.addf %81, %82 : vector<16x16xf32>
    %cst_32 = arith.constant 0.000000e+00 : f32
    %84 = vector.broadcast %cst_32 : f32 to vector<16x16xf32>
    %85 = arith.cmpf ogt, %83, %84 : vector<16x16xf32>
    %cst_33 = arith.constant 2.000000e-01 : f32
    %86 = vector.broadcast %cst_33 : f32 to vector<16x16xf32>
    %87 = arith.mulf %86, %83 : vector<16x16xf32>
    %88 = arith.select %85, %83, %87 : vector<16x16xi1>, vector<16x16xf32>
    %cst_34 = arith.constant -1.000000e+30 : f32
    %89 = vector.broadcast %cst_34 : f32 to vector<16x16xf32>
    %90 = arith.select %2, %88, %89 : vector<16x16xi1>, vector<16x16xf32>
    %cst_35 = arith.constant dense<0xFF800000> : vector<16xf32>
    %91 = vector.multi_reduction <maximumf>, %90, %cst_35 [1] : vector<16x16xf32> to vector<16xf32>
    %92 = vector.shape_cast %91 : vector<16xf32> to vector<16x1xf32>
    %93 = vector.broadcast %92 : vector<16x1xf32> to vector<16x16xf32>
    %94 = arith.subf %90, %93 : vector<16x16xf32>
    %95 = math.exp %94 : vector<16x16xf32>
    %cst_36 = arith.constant dense<0.000000e+00> : vector<16xf32>
    %96 = vector.multi_reduction <add>, %95, %cst_36 [1] : vector<16x16xf32> to vector<16xf32>
    %97 = vector.shape_cast %96 : vector<16xf32> to vector<16x1xf32>
    %98 = tpu.reciprocal %97 {approx = true} : vector<16x1xf32> -> vector<16x1xf32>
    %99 = vector.broadcast %98 : vector<16x1xf32> to vector<16x16xf32>
    %100 = arith.mulf %95, %99 : vector<16x16xf32>
    %101 = arith.truncf %100 : vector<16x16xf32> to vector<16x16xbf16>
    %102 = arith.truncf %77 : vector<16x8xf32> to vector<16x8xbf16>
    %cst_37 = arith.constant dense<0.000000e+00> : vector<16x8xf32>
    %103 = tpu.matmul %101, %102, %cst_37 {dimension_numbers = #tpu.dot_dimension_numbers<[1], [0], [0], [1], [0, 0, 1, 1], [], []>} : vector<16x16xbf16>, vector<16x8xbf16>, vector<16x8xf32> -> vector<16x8xf32>
    %104 = vector.extract_strided_slice %74 {offsets = [0, 8], sizes = [16, 8], strides = [1, 1]} : vector<16x16xf32> to vector<16x8xf32>
    %105 = vector.extract_strided_slice %76 {offsets = [0, 1], sizes = [16, 1], strides = [1, 1]} : vector<16x4xf32> to vector<16x1xf32>
    %106 = vector.extract_strided_slice %76 {offsets = [0, 3], sizes = [16, 1], strides = [1, 1]} : vector<16x4xf32> to vector<16x1xf32>
    %107 = tpu.transpose %105, [1, 0] : vector<16x1xf32> -> vector<1x16xf32>
    %108 = vector.broadcast %106 : vector<16x1xf32> to vector<16x16xf32>
    %109 = vector.broadcast %107 : vector<1x16xf32> to vector<16x16xf32>
    %110 = arith.addf %108, %109 : vector<16x16xf32>
    %cst_38 = arith.constant 0.000000e+00 : f32
    %111 = vector.broadcast %cst_38 : f32 to vector<16x16xf32>
    %112 = arith.cmpf ogt, %110, %111 : vector<16x16xf32>
    %cst_39 = arith.constant 2.000000e-01 : f32
    %113 = vector.broadcast %cst_39 : f32 to vector<16x16xf32>
    %114 = arith.mulf %113, %110 : vector<16x16xf32>
    %115 = arith.select %112, %110, %114 : vector<16x16xi1>, vector<16x16xf32>
    %cst_40 = arith.constant -1.000000e+30 : f32
    %116 = vector.broadcast %cst_40 : f32 to vector<16x16xf32>
    %117 = arith.select %2, %115, %116 : vector<16x16xi1>, vector<16x16xf32>
    %cst_41 = arith.constant dense<0xFF800000> : vector<16xf32>
    %118 = vector.multi_reduction <maximumf>, %117, %cst_41 [1] : vector<16x16xf32> to vector<16xf32>
    %119 = vector.shape_cast %118 : vector<16xf32> to vector<16x1xf32>
    %120 = vector.broadcast %119 : vector<16x1xf32> to vector<16x16xf32>
    %121 = arith.subf %117, %120 : vector<16x16xf32>
    %122 = math.exp %121 : vector<16x16xf32>
    %cst_42 = arith.constant dense<0.000000e+00> : vector<16xf32>
    %123 = vector.multi_reduction <add>, %122, %cst_42 [1] : vector<16x16xf32> to vector<16xf32>
    %124 = vector.shape_cast %123 : vector<16xf32> to vector<16x1xf32>
    %125 = tpu.reciprocal %124 {approx = true} : vector<16x1xf32> -> vector<16x1xf32>
    %126 = vector.broadcast %125 : vector<16x1xf32> to vector<16x16xf32>
    %127 = arith.mulf %122, %126 : vector<16x16xf32>
    %128 = arith.truncf %127 : vector<16x16xf32> to vector<16x16xbf16>
    %129 = arith.truncf %104 : vector<16x8xf32> to vector<16x8xbf16>
    %cst_43 = arith.constant dense<0.000000e+00> : vector<16x8xf32>
    %130 = tpu.matmul %128, %129, %cst_43 {dimension_numbers = #tpu.dot_dimension_numbers<[1], [0], [0], [1], [0, 0, 1, 1], [], []>} : vector<16x16xbf16>, vector<16x8xbf16>, vector<16x8xf32> -> vector<16x8xf32>
    %131 = tpu.concatenate %103, %130 in 1 : vector<16x8xf32>, vector<16x8xf32> -> vector<16x16xf32>
    %132 = vector.broadcast %72 : vector<1x16xf32> to vector<16x16xf32>
    %133 = arith.addf %131, %132 : vector<16x16xf32>
    %cst_44 = arith.constant 0.000000e+00 : f32
    %134 = vector.broadcast %cst_44 : f32 to vector<16x16xf32>
    %135 = arith.maximumf %133, %134 : vector<16x16xf32>
    %c0_45 = arith.constant 0 : index
    %c0_46 = arith.constant 0 : index
    %136 = vector.load %arg2[%c0_45, %c0_46] : memref<2x16xbf16, #tpu.memory_space<vmem>>, vector<2x16xbf16>
    %137 = arith.truncf %135 : vector<16x16xf32> to vector<16x16xbf16>
    %cst_47 = arith.constant dense<0.000000e+00> : vector<2x16xf32>
    %138 = tpu.matmul %136, %137, %cst_47 {dimension_numbers = #tpu.dot_dimension_numbers<[1], [0], [0], [1], [0, 0, 1, 1], [], []>} : vector<2x16xbf16>, vector<16x16xbf16>, vector<2x16xf32> -> vector<2x16xf32>
    %c0_48 = arith.constant 0 : index
    %c0_49 = arith.constant 0 : index
    %139 = vector.load %arg9[%c0_48, %c0_49] : memref<16x16xbf16, #tpu.memory_space<vmem>>, vector<16x16xbf16>
    %c0_50 = arith.constant 0 : index
    %c0_51 = arith.constant 0 : index
    %140 = vector.load %arg10[%c0_50, %c0_51] : memref<1x16xf32, #tpu.memory_space<vmem>>, vector<1x16xf32>
    %141 = arith.truncf %138 : vector<2x16xf32> to vector<2x16xbf16>
    %cst_52 = arith.constant dense<0.000000e+00> : vector<2x16xf32>
    %142 = tpu.matmul %141, %139, %cst_52 {dimension_numbers = #tpu.dot_dimension_numbers<[1], [0], [0], [1], [0, 0, 1, 1], [], []>} : vector<2x16xbf16>, vector<16x16xbf16>, vector<2x16xf32> -> vector<2x16xf32>
    %143 = vector.broadcast %140 : vector<1x16xf32> to vector<2x16xf32>
    %144 = arith.addf %142, %143 : vector<2x16xf32>
    %cst_53 = arith.constant 0.000000e+00 : f32
    %145 = vector.broadcast %cst_53 : f32 to vector<2x16xf32>
    %146 = arith.maximumf %144, %145 : vector<2x16xf32>
    %c0_54 = arith.constant 0 : index
    %c0_55 = arith.constant 0 : index
    %147 = vector.load %arg11[%c0_54, %c0_55] : memref<16x16xbf16, #tpu.memory_space<vmem>>, vector<16x16xbf16>
    %c0_56 = arith.constant 0 : index
    %c0_57 = arith.constant 0 : index
    %148 = vector.load %arg12[%c0_56, %c0_57] : memref<1x16xf32, #tpu.memory_space<vmem>>, vector<1x16xf32>
    %149 = arith.truncf %146 : vector<2x16xf32> to vector<2x16xbf16>
    %cst_58 = arith.constant dense<0.000000e+00> : vector<2x16xf32>
    %150 = tpu.matmul %149, %147, %cst_58 {dimension_numbers = #tpu.dot_dimension_numbers<[1], [0], [0], [1], [0, 0, 1, 1], [], []>} : vector<2x16xbf16>, vector<16x16xbf16>, vector<2x16xf32> -> vector<2x16xf32>
    %151 = vector.broadcast %148 : vector<1x16xf32> to vector<2x16xf32>
    %152 = arith.addf %150, %151 : vector<2x16xf32>
    %cst_59 = arith.constant 0.000000e+00 : f32
    %153 = vector.broadcast %cst_59 : f32 to vector<2x16xf32>
    %154 = arith.maximumf %152, %153 : vector<2x16xf32>
    %155 = arith.truncf %154 : vector<2x16xf32> to vector<2x16xbf16>
    %c0_60 = arith.constant 0 : index
    %c0_61 = arith.constant 0 : index
    %156 = vector.load %arg13[%c0_60, %c0_61] : memref<16x128xbf16, #tpu.memory_space<vmem>>, vector<16x128xbf16>
    %cst_62 = arith.constant dense<0.000000e+00> : vector<2x128xf32>
    %157 = tpu.matmul %155, %156, %cst_62 {dimension_numbers = #tpu.dot_dimension_numbers<[1], [0], [0], [1], [0, 0, 1, 1], [], []>} : vector<2x16xbf16>, vector<16x128xbf16>, vector<2x128xf32> -> vector<2x128xf32>
    %c0_63 = arith.constant 0 : index
    %c0_64 = arith.constant 0 : index
    %158 = vector.load %arg14[%c0_63, %c0_64] : memref<1x128xf32, #tpu.memory_space<vmem>>, vector<1x128xf32>
    %159 = vector.broadcast %158 : vector<1x128xf32> to vector<2x128xf32>
    %160 = arith.addf %157, %159 : vector<2x128xf32>
    %c0_65 = arith.constant 0 : index
    %c0_66 = arith.constant 0 : index
    %161 = vector.load %arg15[%c0_65, %c0_66] : memref<2x128xf32, #tpu.memory_space<vmem>>, vector<2x128xf32>
    tpu.vector_store %arg15[%c0_65, %c0_66], %160 {strides = array<i32>} : memref<2x128xf32, #tpu.memory_space<vmem>>, vector<2x128xf32>,
    return
  }
}

</mosaic_0001>

<bundles_post_ra>
// kernel: tpu_custom_call.1
= control target key start
LH: loop header
LB: loop body
LE: loop exit
PB: predicated region body
PF: predicated region fallthrough
CT: control target
= control target key end

     0   :  { %vm69_vm0 = vcmask 1043456   ;;  %v1261_v2 = vmov 0.0   ;;  %vm1262_vm1 = vmmov 0   ;;  %vm65_vm2 = vcmask 64512   ;;  %s1536_s0 = inlined_call_operand.vmem [shape: f32[16,8], index: 0, kind: input, shape index: {}]   ;;  %s1537_s1 = inlined_call_operand.vmem [shape: bf16[16,16], index: 1, kind: input, shape index: {}]   ;;  %s1538_s2 = inlined_call_operand.vmem [shape: bf16[2,16], index: 2, kind: input, shape index: {}]   ;;  %s1539_s3 = inlined_call_operand.vmem [shape: bf16[8,16], index: 3, kind: input, shape index: {}]   ;;  %s1540_s4 = inlined_call_operand.vmem [shape: bf16[16,4], index: 4, kind: input, shape index: {}]   ;;  %s1541_s5 = inlined_call_operand.vmem [shape: f32[1,16], index: 5, kind: input, shape index: {}]   ;;  %s1542_s6 = inlined_call_operand.vmem [shape: bf16[16,16], index: 6, kind: input, shape index: {}]   ;;  %s1543_s7 = inlined_call_operand.vmem [shape: bf16[16,4], index: 7, kind: input, shape index: {}]   ;;  %s1544_s8 = inlined_call_operand.vmem [shape: f32[1,16], index: 8, kind: input, shape index: {}]   ;;  %s1545_s9 = inlined_call_operand.vmem [shape: bf16[16,16], index: 9, kind: input, shape index: {}]   ;;  %s1546_s10 = inlined_call_operand.vmem [shape: f32[1,16], index: 10, kind: input, shape index: {}]   ;;  %s1547_s11 = inlined_call_operand.vmem [shape: bf16[16,16], index: 11, kind: input, shape index: {}]   ;;  %s1548_s12 = inlined_call_operand.vmem [shape: f32[1,16], index: 12, kind: input, shape index: {}]   ;;  %s1549_s13 = inlined_call_operand.vmem [shape: bf16[16,128], index: 13, kind: input, shape index: {}]   ;;  %s1550_s14 = inlined_call_operand.vmem [shape: f32[1,128], index: 14, kind: input, shape index: {}]   ;;  %s1551_s15 = inlined_call_operand.hbm [shape: f32[2,128], index: 15, kind: output, shape index: {}]  }
   0x1   :  { %v60_v0 = vld [vmem:[%s1539_s3] sm:$0xf]  ;;  %1113 = vmatprep.subr.bf16.mxu0 %v1261_v2  ;;  %1115 = vmatprep.mubr.msk.bf16.mxu0 %vm1262_vm1, %v1261_v2  ;;  %v59_v4 = vld [vmem:[%s1536_s0 + $0x8] sm:$0xff] }
   0x2   :  { %v58_v1 = vld [vmem:[%s1536_s0] sm:$0xff]  ;;  %v71_v3 = vsel %vm69_vm0, %v60_v0, 0  ;;  %1119 = vmatprep.subr.bf16.mxu1 %v1261_v2  ;;  %1121 = vmatprep.mubr.msk.bf16.mxu1 %vm1262_vm1, %v1261_v2 }
   0x3   :  { %1114 = vmatpush3.bf16.msra.mxu0 %v71_v3  ;;  %v64_v5 = vpack.c.bf16 %v59_v4, %v58_v1 }
   0x4   :  { %1125 = vmatprep.subr.bf16.mxu0 %v1261_v2 }
   0x6   :  { %1116 = vmatmul.mubr.msk.bf16.vlgmr.msra.gmra.mrb[0].mxu0 %vm65_vm2, %v64_v5 }
   0x7   :  { %20 = vsyncpa [#allocation3], 0  ;;  %1127 = vmatprep.mubr.msk.bf16.mxu0 %vm1262_vm1, %v1261_v2  ;;  %v1199_v6 = vld [vmem:[%s1540_s4] sm:$0xff]   ;;  %v1263_v7 = vmov 3   ;;  %vm121_vm3 = vcmask 130048   ;;  %s1264_s0 = smov 127   ;;  %v208_v20 = vlaneseq }
   0x8   :  { %1120 = vmatpush3.bf16.msra.mxu1 %v1199_v6  ;;  %1194 = vset.pattern.permute.xlu1 %v1263_v7  ;;  %v1265_v17 = vmov 2   ;;  %v55_v21 = vld [vmem:[%s1537_s1 + $0x4] sm:$0xf]  ;;  %v54_v22 = vld [vmem:[%s1537_s1] sm:$0xf]  ;;  %v1266_v26 = vmov 0  }
   0x9   :  { %1131 = vmatprep.subr.bf16.mxu1 %v1261_v2  ;;  %v209_v23 = vshrl.u32 %v208_v20, 7  ;;  %vm57_vm4 = vcmp.gt.bf16.partialorder %v55_v21, 0  ;;  %vm56_vm5 = vcmp.gt.bf16.partialorder %v54_v22, 0  ;;  %s1267_s1 = smov 120   ;;  %s1268_s28 = smov 8  }
   0xa   :  { %v221_v27 = vsel %vm57_vm4, 65537, %v1266_v26  ;;  %v220_v28 = vsel %vm56_vm5, 65537, %v1266_v26  ;;  %s1269_s25 = smov [#allocation2]  }
   0xb   :  { %v1391_v25 = vsub.s32 0, %v209_v23  ;;  %v223_v30 = vunpack.c.l.b16 %v221_v27  ;;  %v222_v31 = vunpack.c.l.b16 %v220_v28 }
   0xd   :  { %vm1394_vm6 = vcmp.ne.s32.totalorder %v223_v30, 0  ;;  %vm1398_vm7 = vcmp.ne.s32.totalorder %v222_v31, 0 }
  0xd9   :  { %v107_v8 = vpop.f32.mrb[0].mxu0 }
  0xda   :  { %v1117_v9 = vpop.f32.mrb[1].mxu0 }
  0xdb   :  { %v110_v10 = vpop.f32.mrb[2].mxu0 }
  0xdc   :  { %v1374_v11 = vpack.c.bf16 %v110_v10, %v107_v8  ;;  %v1118_v12 = vpop.f32.mrb[3].mxu0 }
  0xde   :  { %1122 = vmatmul.mubr.msk.bf16.vlgmr.msra.gmra.mrb[0].mxu1 %vm121_vm3, %v1374_v11  ;;  %1126 = vmatpush3.bf16.msra.mxu0 %v1374_v11 }
  0xdf   :  { %1133 = vmatprep.mubr.msk.bf16.mxu1 %vm1262_vm1, %v1261_v2  ;;  %1137 = vmatprep.subr.bf16.mxu0 %v1261_v2 }
 0x1b1   :  { %v159_v13 = vpop.f32.mrb[0].mxu1 }
 0x1b2   :  { %334 = vperm.xlu1 %1194, %v159_v13   ;;  %295 = vrot.lane.b32.xlu0 %v159_v13, %s1264_s0  ;;  %v1123_v14 = vpop.f32.mrb[1].mxu1 }
 0x1b3   :  { %v162_v15 = vpop.f32.mrb[2].mxu1 }
 0x1b4   :  { %v1124_v16 = vpop.f32.mrb[3].mxu1 }
 0x1b6   :  { %338 = vperm.xlu1 %1194, %v162_v15   ;;  %297 = vrot.lane.b32.xlu0 %v162_v15, %s1264_s0 }
 0x1ba   :  { %1195 = vset.pattern.permute.xlu1 %v1265_v17 }
 0x1bb   :  { %200 = vperm.xlu1 %1195, %v159_v13  }
 0x1bf   :  { %205 = vperm.xlu1 %1195, %v162_v15  }
 0x224   :  { %v296_v18 = vpop.permute.xlu0 %295 }
 0x225   :  { %301 = vxpose.xlu0.b32.start [1/2] (short) (narrow) %v296_v18, 8 }
 0x228   :  { %v298_v19 = vpop.permute.xlu0 %297 }
 0x229   :  { %302 = vxpose.xlu0.b32.end [2/2] (short) (narrow) %v298_v19, 8 }
 0x231   :  { %v335_v24 = vpop.permute.xlu1 %334 }
 0x235   :  { %v339_v33 = vpop.permute.xlu1 %338 }
 0x23a   :  { %v201_v46 = vpop.permute.xlu1 %200 }
 0x23e   :  { %v206_v47 = vpop.permute.xlu1 %205 }
 0x2a5   :  { %v317_v29 = vpop.trf.xlu0 }
 0x2a6   :  { %v344_v32 = vrot.slane %v317_v29, %v1391_v25 }
 0x2a8   :  { %v345_v34 = vadd.f32 %v344_v32, %v335_v24  ;;  %v346_v35 = vadd.f32 %v344_v32, %v339_v33 }
 0x2aa   :  { %vm348_vm8 = vcmp.gt.f32.partialorder %v346_v35, 0.0  ;;  %v350_v38 = vmul.f32 0.2, %v346_v35  ;;  %vm347_vm9 = vcmp.gt.f32.partialorder %v345_v34, 0.0  ;;  %v349_v39 = vmul.f32 0.2, %v345_v34 }
 0x2ac   :  { %v352_v40 = vsel %vm348_vm8, %v346_v35, %v350_v38  ;;  %v351_v41 = vsel %vm347_vm9, %v345_v34, %v349_v39 }
 0x2ad   :  { %v354_v42 = vsel %vm1394_vm6, %v352_v40, -1e+30  ;;  %v353_v43 = vsel %vm1398_vm7, %v351_v41, -1e+30  ;;  %v1200_v41 = vld [vmem:[%s1542_s6] sm:$0xff]  }
 0x2ae   :  { %v358_v44 = vsel %vm121_vm3, %v354_v42, -inf  ;;  %v355_v45 = vsel %vm121_vm3, %v353_v43, -inf }
 0x2af   :  { %359 = vmax.xlane.f32.xlu0 %v358_v44  ;;  %356 = vmax.xlane.f32.xlu1 %v355_v45 }
 0x2e2   :  { %166 = vxpose.xlu1.b32.start [1/2] (short) (narrow) %v159_v13, 8 }
 0x2e6   :  { %167 = vxpose.xlu1.b32.end [2/2] (short) (narrow) %v162_v15, 8 }
 0x304   :  { %1196 = vset.pattern.permute.xlu1 %v1263_v7 }
 0x33c   :  { %v357_v48 = vpop.xlane.xlu1 %356  ;;  %v360_v50 = vpop.xlane.xlu0 %359 }
 0x33d   :  { %v361_v49 = vsub.f32 %v353_v43, %v357_v48  ;;  %v362_v51 = vsub.f32 %v354_v42, %v360_v50  ;;  %v1071_v42 = vld [vmem:[%s1541_s5] ss:$0 sm:$0xff] }
 0x33f   :  { %v363_v52 = vmul.f32 1.442695, %v361_v49  ;;  %v365_v57 = vmul.f32 1.442695, %v362_v51 }
 0x341   :  { %1205 = vpow2.f32 %v363_v52 }
 0x342   :  { %1207 = vpow2.f32 %v365_v57 }
 0x34b   :  { %v1206_v3 = vpop.eup %1205 }
 0x34c   :  { %v367_v4 = vsel %vm121_vm3, %v1206_v3, 0.0  ;;  %v1208_v5 = vpop.eup %1207 }
 0x34d   :  { %v370_v6 = vsel %vm121_vm3, %v1208_v5, 0.0 }
 0x362   :  { %v182_v53 = vpop.trf.xlu1 }
 0x363   :  { %v211_v54 = vrot.slane %v182_v53, %v1391_v25 }
 0x365   :  { %v212_v55 = vadd.f32 %v211_v54, %v201_v46  ;;  %v213_v56 = vadd.f32 %v211_v54, %v206_v47 }
 0x367   :  { %vm214_vm10 = vcmp.gt.f32.partialorder %v212_v55, 0.0  ;;  %v216_v58 = vmul.f32 0.2, %v212_v55  ;;  %vm215_vm11 = vcmp.gt.f32.partialorder %v213_v56, 0.0  ;;  %v217_v59 = vmul.f32 0.2, %v213_v56 }
 0x369   :  { %v218_v60 = vsel %vm214_vm10, %v212_v55, %v216_v58  ;;  %v219_v61 = vsel %vm215_vm11, %v213_v56, %v217_v59  ;;  %v1201_v56 = vld [vmem:[%s1543_s7] sm:$0xff]  }
 0x36a   :  { %v226_v62 = vsel %vm1398_vm7, %v218_v60, -1e+30  ;;  %v227_v0 = vsel %vm1394_vm6, %v219_v61, -1e+30 }
 0x36b   :  { %v228_v63 = vsel %vm121_vm3, %v226_v62, -inf  ;;  %v231_v1 = vsel %vm121_vm3, %v227_v0, -inf }
 0x36c   :  { %229 = vmax.xlane.f32.xlu0 %v228_v63 }
 0x370   :  { %232 = vmax.xlane.f32.xlu0 %v231_v1 }
 0x374   :  { %368 = vadd.xlane.f32.xlu0 %v367_v4 }
 0x378   :  { %371 = vadd.xlane.f32.xlu0 %v370_v6 }
 0x38e   :  { %379 = vrot.lane.b32.xlu0 %v1374_v11, %s1267_s1 }
 0x3f9   :  { %v230_v8 = vpop.xlane.xlu0 %229 }
 0x3fa   :  { %v234_v9 = vsub.f32 %v226_v62, %v230_v8 }
 0x3fc   :  { %v236_v10 = vmul.f32 1.442695, %v234_v9 }
 0x3fd   :  { %v233_v12 = vpop.xlane.xlu0 %232 }
 0x3fe   :  { %1209 = vpow2.f32 %v236_v10  ;;  %v235_v13 = vsub.f32 %v227_v0, %v233_v12 }
 0x400   :  { %v238_v14 = vmul.f32 1.442695, %v235_v13 }
 0x401   :  { %v369_v15 = vpop.xlane.xlu0 %368 }
 0x402   :  { %1211 = vpow2.f32 %v238_v14 }
 0x403   :  { %1213 = vrcp.f32 %v369_v15 }
 0x405   :  { %v372_v16 = vpop.xlane.xlu0 %371 }
 0x406   :  { %1215 = vrcp.f32 %v372_v16 }
 0x408   :  { %v1210_v18 = vpop.eup %1209 }
 0x409   :  { %v380_v19 = vpop.permute.xlu0 %379  ;;  %v240_v20 = vsel %vm121_vm3, %v1210_v18, 0.0 }
 0x40a   :  { %241 = vadd.xlane.f32.xlu1 %v240_v20  ;;  %1132 = vmatpush3.bf16.msra.mxu1 %v380_v19 }
 0x40b   :  { %1143 = vmatprep.subr.bf16.mxu1 %v1261_v2 }
 0x40c   :  { %v1212_v11 = vpop.eup %1211 }
 0x40d   :  { %v243_v21 = vsel %vm121_vm3, %v1212_v11, 0.0  ;;  %v1214_v22 = vpop.eup %1213 }
 0x40e   :  { %244 = vadd.xlane.f32.xlu0 %v243_v21  ;;  %v375_v24 = vmul.f32 %v1214_v22, %v1206_v3 }
 0x410   :  { %v1216_v23 = vpop.eup %1215 }
 0x411   :  { %v376_v26 = vmul.f32 %v1216_v23, %v1208_v5 }
 0x413   :  { %v377_v27 = vpack.c.bf16 %v376_v26, %v375_v24 }
 0x415   :  { %1134 = vmatmul.mubr.msk.bf16.vlgmr.msra.gmra.mrb[4].mxu1 %vm121_vm3, %v377_v27 }
 0x416   :  { %1145 = vmatprep.mubr.msk.bf16.mxu1 %vm1262_vm1, %v1261_v2  ;;  %1144 = vmatpush3.bf16.msra.mxu1 %v1201_v56 }
 0x417   :  { %1155 = vmatprep.subr.bf16.mxu1 %v1261_v2 }
 0x497   :  { %v242_v28 = vpop.xlane.xlu1 %241 }
 0x498   :  { %1217 = vrcp.f32 %v242_v28 }
 0x49b   :  { %v245_v29 = vpop.xlane.xlu0 %244 }
 0x49c   :  { %1219 = vrcp.f32 %v245_v29 }
 0x4a2   :  { %v1218_v30 = vpop.eup %1217 }
 0x4a3   :  { %v248_v32 = vmul.f32 %v1218_v30, %v1210_v18 }
 0x4a6   :  { %v1220_v31 = vpop.eup %1219 }
 0x4a7   :  { %v249_v33 = vmul.f32 %v1220_v31, %v1212_v11 }
 0x4a9   :  { %v250_v34 = vpack.c.bf16 %v249_v33, %v248_v32 }
 0x4ab   :  { %1128 = vmatmul.mubr.msk.bf16.vlgmr.msra.gmra.mrb[4].mxu0 %vm121_vm3, %v250_v34 }
 0x4ac   :  { %1139 = vmatprep.mubr.msk.bf16.mxu0 %vm1262_vm1, %v1261_v2  ;;  %1138 = vmatpush3.bf16.msra.mxu0 %v1200_v41 }
 0x4ad   :  { %1149 = vmatprep.subr.bf16.mxu0 %v1261_v2 }
 0x4e8   :  { %v419_v35 = vpop.f32.mrb[4].mxu1 }
 0x4e9   :  { %428 = vrot.lane.b32.xlu1 %v419_v35, %s1268_s28  ;;  %v1135_v38 = vpop.f32.mrb[5].mxu1 }
 0x4ea   :  { %v422_v39 = vpop.f32.mrb[6].mxu1 }
 0x4eb   :  { %430 = vrot.lane.b32.xlu0 %v422_v39, %s1268_s28  ;;  %v1136_v40 = vpop.f32.mrb[7].mxu1 }
 0x55b   :  { %v429_v43 = vpop.permute.xlu1 %428 }
 0x55d   :  { %v431_v47 = vpop.permute.xlu0 %430 }
 0x57e   :  { %v288_v44 = vpop.f32.mrb[4].mxu0 }
 0x57f   :  { %v434_v45 = vsel %vm65_vm2, %v288_v44, %v429_v43  ;;  %v1129_v46 = vpop.f32.mrb[5].mxu0 }
 0x580   :  { %v442_v48 = vadd.f32 %v1071_v42, %v434_v45  ;;  %v291_v49 = vpop.f32.mrb[6].mxu0 }
 0x581   :  { %v435_v50 = vsel %vm65_vm2, %v291_v49, %v431_v47  ;;  %v1130_v51 = vpop.f32.mrb[7].mxu0 }
 0x582   :  { %v443_v52 = vadd.f32 %v1071_v42, %v435_v50  ;;  %v444_v53 = vmax.f32 %v442_v48, 0.0 }
 0x584   :  { %v445_v54 = vmax.f32 %v443_v52, 0.0 }
 0x586   :  { %v451_v55 = vpack.c.bf16 %v445_v54, %v444_v53 }
 0x588   :  { %1140 = vmatmul.mubr.msk.bf16.vlgmr.msra.gmra.mrb[8].mxu0 %vm121_vm3, %v451_v55 }
 0x589   :  { %1151 = vmatprep.mubr.msk.bf16.mxu0 %vm1262_vm1, %v1261_v2 }
 0x65b   :  { %v495_v57 = vpop.f32.mrb[8].mxu0 }
 0x65c   :  { %v1141_v58 = vpop.f32.mrb[9].mxu0 }
 0x65d   :  { %v498_v59 = vpop.f32.mrb[10].mxu0 }
 0x65e   :  { %v1447_v60 = vpack.c.bf16 %v498_v59, %v495_v57  ;;  %v1142_v61 = vpop.f32.mrb[11].mxu0 }
 0x660   :  { %1146 = vmatmul.mubr.msk.bf16.vlgmr.msra.gmra.mrb[8].mxu1 %vm121_vm3, %v1447_v60  ;;  %1150 = vmatpush3.bf16.msra.mxu0 %v1447_v60 }
 0x661   :  { %1157 = vmatprep.mubr.msk.bf16.mxu1 %vm1262_vm1, %v1261_v2  ;;  %1161 = vmatprep.subr.bf16.mxu0 %v1261_v2 }
 0x733   :  { %v546_v62 = vpop.f32.mrb[8].mxu1 }
 0x734   :  { %676 = vrot.lane.b32.xlu1 %v546_v62, %s1264_s0  ;;  %v1147_v63 = vpop.f32.mrb[9].mxu1 }
 0x735   :  { %v549_v0 = vpop.f32.mrb[10].mxu1 }
 0x736   :  { %v1148_v1 = vpop.f32.mrb[11].mxu1 }
 0x738   :  { %678 = vrot.lane.b32.xlu1 %v549_v0, %s1264_s0 }
 0x73c   :  { %715 = vperm.xlu1 %1196, %v546_v62  }
 0x740   :  { %719 = vperm.xlu1 %1196, %v549_v0  }
 0x744   :  { %1197 = vset.pattern.permute.xlu1 %v1265_v17 }
 0x745   :  { %587 = vperm.xlu1 %1197, %v546_v62  }
 0x749   :  { %592 = vperm.xlu1 %1197, %v549_v0  }
 0x7a6   :  { %v677_v3 = vpop.permute.xlu1 %676 }
 0x7a7   :  { %682 = vxpose.xlu0.b32.start [1/2] (short) (narrow) %v677_v3, 8 }
 0x7aa   :  { %v679_v4 = vpop.permute.xlu1 %678 }
 0x7ab   :  { %683 = vxpose.xlu0.b32.end [2/2] (short) (narrow) %v679_v4, 8 }
 0x7bb   :  { %v716_v5 = vpop.permute.xlu1 %715 }
 0x7bf   :  { %v720_v9 = vpop.permute.xlu1 %719 }
 0x7c4   :  { %v588_v20 = vpop.permute.xlu1 %587 }
 0x7c8   :  { %v593_v11 = vpop.permute.xlu1 %592 }
 0x7d4   :  { %1198 = vset.pattern.permute.xlu0 %v1263_v7 }
 0x827   :  { %v698_v6 = vpop.trf.xlu0 }
 0x828   :  { %v725_v8 = vrot.slane %v698_v6, %v1391_v25 }
 0x82a   :  { %v726_v10 = vadd.f32 %v725_v8, %v716_v5  ;;  %v727_v12 = vadd.f32 %v725_v8, %v720_v9 }
 0x82c   :  { %vm728_vm12 = vcmp.gt.f32.partialorder %v726_v10, 0.0  ;;  %v730_v13 = vmul.f32 0.2, %v726_v10  ;;  %vm729_vm13 = vcmp.gt.f32.partialorder %v727_v12, 0.0  ;;  %v731_v14 = vmul.f32 0.2, %v727_v12 }
 0x82e   :  { %v732_v17 = vsel %vm728_vm12, %v726_v10, %v730_v13  ;;  %v733_v15 = vsel %vm729_vm13, %v727_v12, %v731_v14  ;;  %v1202_v10 = vld [vmem:[%s1545_s9] sm:$0xff]  }
 0x82f   :  { %v734_v16 = vsel %vm1398_vm7, %v732_v17, -1e+30  ;;  %v735_v18 = vsel %vm1394_vm6, %v733_v15, -1e+30  ;;  %v1078_v12 = vld [vmem:[%s1544_s8] ss:$0 sm:$0xff] }
 0x830   :  { %v736_v7 = vsel %vm121_vm3, %v734_v16, -inf  ;;  %v739_v19 = vsel %vm121_vm3, %v735_v18, -inf }
 0x831   :  { %737 = vmax.xlane.f32.xlu1 %v736_v7  ;;  %740 = vmax.xlane.f32.xlu0 %v739_v19 }
 0x864   :  { %553 = vxpose.xlu1.b32.start [1/2] (short) (narrow) %v546_v62, 8 }
 0x868   :  { %554 = vxpose.xlu1.b32.end [2/2] (short) (narrow) %v549_v0, 8 }
 0x8be   :  { %v738_v21 = vpop.xlane.xlu1 %737  ;;  %v741_v23 = vpop.xlane.xlu0 %740 }
 0x8bf   :  { %v742_v22 = vsub.f32 %v734_v16, %v738_v21  ;;  %v743_v24 = vsub.f32 %v735_v18, %v741_v23 }
 0x8c1   :  { %v744_v26 = vmul.f32 1.442695, %v742_v22  ;;  %v746_v31 = vmul.f32 1.442695, %v743_v24  ;;  %v827_v24 = vld [vmem:[%s1538_s2] sm:$0x1] }
 0x8c3   :  { %1221 = vpow2.f32 %v744_v26 }
 0x8c4   :  { %1223 = vpow2.f32 %v746_v31  ;;  %v1203_v31 = vld [vmem:[%s1547_s11] sm:$0xff]  }
 0x8cd   :  { %v1222_v41 = vpop.eup %1221 }
 0x8ce   :  { %v748_v42 = vsel %vm121_vm3, %v1222_v41, 0.0  ;;  %v1224_v43 = vpop.eup %1223 }
 0x8cf   :  { %v751_v44 = vsel %vm121_vm3, %v1224_v43, 0.0 }
 0x8e4   :  { %v569_v27 = vpop.trf.xlu1 }
 0x8e5   :  { %v598_v28 = vrot.slane %v569_v27, %v1391_v25 }
 0x8e7   :  { %v599_v29 = vadd.f32 %v598_v28, %v588_v20  ;;  %v600_v30 = vadd.f32 %v598_v28, %v593_v11 }
 0x8e9   :  { %vm601_vm14 = vcmp.gt.f32.partialorder %v599_v29, 0.0  ;;  %v603_v32 = vmul.f32 0.2, %v599_v29  ;;  %vm602_vm15 = vcmp.gt.f32.partialorder %v600_v30, 0.0  ;;  %v604_v33 = vmul.f32 0.2, %v600_v30 }
 0x8eb   :  { %v605_v34 = vsel %vm601_vm14, %v599_v29, %v603_v32  ;;  %v606_v35 = vsel %vm602_vm15, %v600_v30, %v604_v33  ;;  %v1080_v32 = vld [vmem:[%s1546_s10] ss:$0 sm:$0xff] }
 0x8ec   :  { %v607_v38 = vsel %vm1398_vm7, %v605_v34, -1e+30  ;;  %v608_v25 = vsel %vm1394_vm6, %v606_v35, -1e+30 }
 0x8ed   :  { %v609_v39 = vsel %vm121_vm3, %v607_v38, -inf  ;;  %v612_v40 = vsel %vm121_vm3, %v608_v25, -inf }
 0x8ee   :  { %610 = vmax.xlane.f32.xlu0 %v609_v39 }
 0x8f2   :  { %613 = vmax.xlane.f32.xlu0 %v612_v40 }
 0x8f6   :  { %749 = vadd.xlane.f32.xlu0 %v748_v42 }
 0x8fa   :  { %752 = vadd.xlane.f32.xlu0 %v751_v44 }
 0x910   :  { %760 = vrot.lane.b32.xlu0 %v1447_v60, %s1267_s1 }
 0x97b   :  { %v611_v37 = vpop.xlane.xlu0 %610 }
 0x97c   :  { %v615_v45 = vsub.f32 %v607_v38, %v611_v37 }
 0x97e   :  { %v617_v46 = vmul.f32 1.442695, %v615_v45 }
 0x97f   :  { %v614_v47 = vpop.xlane.xlu0 %613 }
 0x980   :  { %1225 = vpow2.f32 %v617_v46  ;;  %v616_v36 = vsub.f32 %v608_v25, %v614_v47 }
 0x982   :  { %v619_v48 = vmul.f32 1.442695, %v616_v36  ;;  %v1086_v36 = vld [vmem:[%s1550_s14] ss:$0 sm:$0xff] }
 0x983   :  { %v750_v49 = vpop.xlane.xlu0 %749 }
 0x984   :  { %1227 = vpow2.f32 %v619_v48 }
 0x985   :  { %1229 = vrcp.f32 %v750_v49 }
 0x987   :  { %v753_v50 = vpop.xlane.xlu0 %752 }
 0x988   :  { %1231 = vrcp.f32 %v753_v50 }
 0x98a   :  { %v1226_v51 = vpop.eup %1225 }
 0x98b   :  { %v761_v52 = vpop.permute.xlu0 %760  ;;  %v621_v53 = vsel %vm121_vm3, %v1226_v51, 0.0 }
 0x98c   :  { %622 = vadd.xlane.f32.xlu1 %v621_v53  ;;  %1156 = vmatpush3.bf16.msra.mxu1 %v761_v52 }
 0x98d   :  { %1167 = vmatprep.subr.bf16.mxu1 %v1261_v2 }
 0x98e   :  { %v1228_v54 = vpop.eup %1227 }
 0x98f   :  { %v624_v55 = vsel %vm121_vm3, %v1228_v54, 0.0  ;;  %v1230_v56 = vpop.eup %1229 }
 0x990   :  { %625 = vadd.xlane.f32.xlu0 %v624_v55  ;;  %v756_v58 = vmul.f32 %v1230_v56, %v1222_v41  ;;  %v1083_v41 = vld [vmem:[%s1548_s12] ss:$0 sm:$0xff] }
 0x992   :  { %v1232_v57 = vpop.eup %1231 }
 0x993   :  { %v757_v59 = vmul.f32 %v1232_v57, %v1224_v43 }
 0x995   :  { %v758_v60 = vpack.c.bf16 %v757_v59, %v756_v58 }
 0x997   :  { %1158 = vmatmul.mubr.msk.bf16.vlgmr.msra.gmra.mrb[12].mxu1 %vm121_vm3, %v758_v60 }
 0x998   :  { %1169 = vmatprep.mubr.msk.bf16.mxu1 %vm1262_vm1, %v1261_v2  ;;  %1168 = vmatpush3.bf16.msra.mxu1 %v1202_v10 }
 0x999   :  { %1179 = vmatprep.subr.bf16.mxu1 %v1261_v2 }
 0xa19   :  { %v623_v61 = vpop.xlane.xlu1 %622 }
 0xa1a   :  { %1233 = vrcp.f32 %v623_v61 }
 0xa1d   :  { %v626_v62 = vpop.xlane.xlu0 %625 }
 0xa1e   :  { %1235 = vrcp.f32 %v626_v62 }
 0xa24   :  { %v1234_v63 = vpop.eup %1233 }
 0xa25   :  { %v629_v1 = vmul.f32 %v1234_v63, %v1226_v51 }
 0xa28   :  { %v1236_v0 = vpop.eup %1235 }
 0xa29   :  { %v630_v3 = vmul.f32 %v1236_v0, %v1228_v54 }
 0xa2b   :  { %v631_v4 = vpack.c.bf16 %v630_v3, %v629_v1 }
 0xa2d   :  { %1152 = vmatmul.mubr.msk.bf16.vlgmr.msra.gmra.mrb[12].mxu0 %vm121_vm3, %v631_v4 }
 0xa2e   :  { %1163 = vmatprep.mubr.msk.bf16.mxu0 %vm1262_vm1, %v1261_v2 }
 0xa6a   :  { %v800_v5 = vpop.f32.mrb[12].mxu1 }
 0xa6b   :  { %809 = vrot.lane.b32.xlu1 %v800_v5, %s1268_s28  ;;  %v1159_v6 = vpop.f32.mrb[13].mxu1 }
 0xa6c   :  { %v803_v8 = vpop.f32.mrb[14].mxu1 }
 0xa6d   :  { %811 = vrot.lane.b32.xlu0 %v803_v8, %s1268_s28  ;;  %v1160_v9 = vpop.f32.mrb[15].mxu1 }
 0xadd   :  { %v810_v13 = vpop.permute.xlu1 %809 }
 0xadf   :  { %v812_v16 = vpop.permute.xlu0 %811 }
 0xb00   :  { %v669_v14 = vpop.f32.mrb[12].mxu0 }
 0xb01   :  { %v815_v17 = vsel %vm65_vm2, %v669_v14, %v810_v13  ;;  %v1153_v15 = vpop.f32.mrb[13].mxu0 }
 0xb02   :  { %v823_v18 = vadd.f32 %v1078_v12, %v815_v17  ;;  %v672_v7 = vpop.f32.mrb[14].mxu0 }
 0xb03   :  { %v816_v19 = vsel %vm65_vm2, %v672_v7, %v812_v16  ;;  %v1154_v20 = vpop.f32.mrb[15].mxu0 }
 0xb04   :  { %v824_v11 = vadd.f32 %v1078_v12, %v816_v19  ;;  %v825_v21 = vmax.f32 %v823_v18, 0.0 }
 0xb06   :  { %v826_v22 = vmax.f32 %v824_v11, 0.0 }
 0xb08   :  { %v828_v23 = vpack.c.bf16 %v826_v22, %v825_v21 }
 0xb0a   :  { %1162 = vmatpush3.bf16.msra.mxu0 %v828_v23 }
 0xb0b   :  { %1173 = vmatprep.subr.bf16.mxu0 %v1261_v2 }
 0xb0d   :  { %1164 = vmatmul.mubr.msk.bf16.vlgmr.msra.gmra.mrb[16].mxu0 %vm121_vm3, %v827_v24 }
 0xb0e   :  { %1175 = vmatprep.mubr.msk.bf16.mxu0 %vm1262_vm1, %v1261_v2  ;;  %1174 = vmatpush3.bf16.msra.mxu0 %v1203_v31 }
 0xbe0   :  { %v866_v26 = vpop.f32.mrb[16].mxu0 }
 0xbe1   :  { %v875_v27 = vpack.c.bf16 %v866_v26, %v866_v26  ;;  %v1165_v28 = vpop.f32.mrb[17].mxu0 }
 0xbe2   :  { %v869_v29 = vpop.f32.mrb[18].mxu0 }
 0xbe3   :  { %v1166_v30 = vpop.f32.mrb[19].mxu0  ;;  %1170 = vmatmul.mubr.msk.bf16.vlgmr.msra.gmra.mrb[16].mxu1 %vm121_vm3, %v875_v27 }
 0xbe4   :  { %1181 = vmatprep.mubr.msk.bf16.mxu1 %vm1262_vm1, %v1261_v2  ;;  %v1204_v2 = vld [vmem:[%s1549_s13] sm:$0xff]   ;;  %s1058_s13 = sshll.u32 %s1269_s25, 4  ;;  %s1059_s13 = int_to_ptr.vmem [resolvable:$true] %s1058_s13 }
 0xbe5   :  { %1180 = vmatpush3.bf16.msra.mxu1 %v1204_v2  ;;  %s1237_s12 = scalar_lea.vmem %s1059_s13, 32  ;;  %p1242_p1 = scmp.lt.s32.totalorder %s1059_s13, %s1059_s13 }
 0xbe6   :  { %p1238_p0 = scmp.ne.s32.totalorder %s1059_s13, %s1237_s12  ;;  %p1243_p2 = scmp.lt.s32.totalorder %s1237_s12, %s1237_s12 }
 0xbe8   :  { %p1244_p3 = por %p1243_p2, %p1242_p1 }
 0xbea   :  { %p1245_p4 = pnand %p1244_p3, %p1238_p0 }
 0xcb6   :  { %v925_v33 = vpop.f32.mrb[16].mxu1 }
 0xcb7   :  { %v926_v34 = vadd.f32 %v1080_v32, %v925_v33  ;;  %v1171_v35 = vpop.f32.mrb[17].mxu1 }
 0xcb8   :  { %v928_v38 = vpop.f32.mrb[18].mxu1 }
 0xcb9   :  { %v931_v39 = vmax.f32 %v926_v34, 0.0  ;;  %v1172_v25 = vpop.f32.mrb[19].mxu1 }
 0xcbb   :  { %v935_v40 = vpack.c.bf16 %v931_v39, %v931_v39 }
 0xcbd   :  { %1176 = vmatmul.mubr.msk.bf16.vlgmr.msra.gmra.mrb[20].mxu0 %vm121_vm3, %v935_v40 }
 0xd90   :  { %v985_v42 = vpop.f32.mrb[20].mxu0 }
 0xd91   :  { %v986_v43 = vadd.f32 %v1083_v41, %v985_v42  ;;  %v1177_v44 = vpop.f32.mrb[21].mxu0 }
 0xd92   :  { %v988_v37 = vpop.f32.mrb[22].mxu0 }
 0xd93   :  { %v991_v45 = vmax.f32 %v986_v43, 0.0  ;;  %v1178_v46 = vpop.f32.mrb[23].mxu0 }
 0xd95   :  { %v992_v47 = vpack.c.bf16 %v991_v45, %v991_v45 }
 0xd97   :  { %1182 = vmatmul.mubr.msk.bf16.vlgmr.msra.gmra.mrb[20].mxu1 %vm121_vm3, %v992_v47 }
 0xe6a   :  { %v1045_v48 = vpop.f32.mrb[20].mxu1 }
 0xe6b   :  { %v1046_v49 = vadd.f32 %v1086_v36, %v1045_v48  ;;  %v1183_v50 = vpop.f32.mrb[21].mxu1 }
 0xe6c   :  { %v1048_v51 = vpop.f32.mrb[22].mxu1 }
 0xe6d   :  { %1051 = vst [vmem:[#allocation2] sm:$0x3] %v1046_v49  ;;  %v1184_v52 = vpop.f32.mrb[23].mxu1 }
 0xe6e   :  { %1248 = shalt.err (!%p1245_p4)
}
 0xe6f   :  { %s1249_s14 = scalar_lea.hbm %s1551_s15, 32 }
 0xe70   :  { %p1250_p5 = scmp.ne.s32.totalorder %s1551_s15, %s1249_s14  ;;  %p1253_p6 = scmp.lt.u32.totalorder %s1249_s14, %s1551_s15 }
 0xe72   :  { %p1255_p7 = pnand %p1253_p6, %p1250_p5 }
 0xe74   :  { %1258 = shalt.err (!%p1255_p7)
}
 0xe75   :  { %1061 = dma.vmem_to_hbm [thread:$0]  %s1059_s13, 32, %s1551_s15, [#allocation3]  }
 0xe76   :  { %1259 = dma.done.wait [#allocation3], 32  }
 0xe77   :  { %1260 = vsyncadd [#allocation3], 4294967264 }
 0xe78   :  { %1065 = vsyncpa [#allocation3], 1 }

</bundles_post_ra>
